<compile_context>
chip_gen: v5e
topology: v5e:2x2
jax: 0.10.0
libtpu: 0.0.40
codegen_flags: <defaults>
</compile_context>

<pallas_src>
import math
import functools

import jax
import jax.numpy as jnp
from jax import lax
from jax.experimental import pallas as pl
from jax.experimental.pallas import tpu as pltpu


def _pick_tile(dim, target, align):
    """Largest tile <= target that divides `dim` and is a multiple of `align`;
    falls back to the full dimension (always a legal BlockSpec block)."""
    if dim <= target:
        return dim
    t = (target // align) * align
    while t >= align:
        if dim % t == 0:
            return t
        t -= align
    return dim


# ----------------------------------------------------------------------------
# Tiled linear layer: y = x @ W_t + b   (used for fused qkv, w_q/w_k/w_v, w_o)
# ----------------------------------------------------------------------------
def _linear_kernel(x_ref, w_ref, b_ref, o_ref, acc_ref):
    # grid = (M/tm, N/tn, K/tk); K (reduction) is the innermost "arbitrary" axis.
    @pl.when(pl.program_id(2) == 0)
    def _init():
        acc_ref[...] = jnp.zeros_like(acc_ref)

    acc_ref[...] += jnp.dot(x_ref[...], w_ref[...],
                            preferred_element_type=jnp.float32)

    @pl.when(pl.program_id(2) == pl.num_programs(2) - 1)
    def _finalize():
        o_ref[...] = (acc_ref[...] + b_ref[...].astype(jnp.float32)).astype(o_ref.dtype)


def linear(x, w_t, b, *, out_dtype=jnp.float32, tm=256, tn=256, tk=512):
    """x: (M, K); w_t: (K, N) pre-transposed; b: (1, N) f32.

    Matmul inputs run in w_t.dtype (f32 or bf16); accumulation + bias in f32.
    """
    M, K = x.shape
    Kw, N = w_t.shape
    assert K == Kw
    x = x.astype(w_t.dtype)
    tm = _pick_tile(M, tm, 8)
    tn = _pick_tile(N, tn, 128)
    tk = _pick_tile(K, tk, 128)
    grid = (M // tm, N // tn, K // tk)
    return pl.pallas_call(
        _linear_kernel,
        grid=grid,
        out_shape=jax.ShapeDtypeStruct((M, N), out_dtype),
        in_specs=[
            pl.BlockSpec((tm, tk), lambda i, j, k: (i, k)),
            pl.BlockSpec((tk, tn), lambda i, j, k: (k, j)),
            pl.BlockSpec((1, tn), lambda i, j, k: (0, j)),
        ],
        out_specs=pl.BlockSpec((tm, tn), lambda i, j, k: (i, j)),
        scratch_shapes=[pltpu.VMEM((tm, tn), jnp.float32)],
        compiler_params=pltpu.CompilerParams(
            dimension_semantics=("parallel", "parallel", "arbitrary")),
    )(x, w_t, b)


# ----------------------------------------------------------------------------
# Attention: per-batch, q-tiled, all heads per grid step (lane-dense blocks)
# ----------------------------------------------------------------------------
def _attention_kernel(qkv_ref, m_ref, o_ref, s_ref, *,
                      h, d_k, tq, scale, compute_dtype):
    d_model = h * d_k
    qi = pl.program_id(1)
    row0 = pl.multiple_of(qi * tq, tq)

    masked = m_ref[0, 0] == 0                          # (tq, S) bool

    ctx_parts = []
    for head in range(h):                              # static unroll over heads
        c0 = head * d_k
        qh = qkv_ref[0, pl.ds(row0, tq), c0:c0 + d_k].astype(compute_dtype)
        kh = qkv_ref[0, :, d_model + c0:d_model + c0 + d_k].astype(compute_dtype)
        vh = qkv_ref[0, :, 2 * d_model + c0:2 * d_model + c0 + d_k].astype(compute_dtype)

        # Q @ K^T without materializing K^T: contract the d_k axes directly.
        s = lax.dot_general(qh, kh, (((1,), (1,)), ((), ())),
                            preferred_element_type=jnp.float32) * scale
        s = jnp.where(masked, jnp.float32(-1e9), s)

        # numerically stable softmax, all in f32
        s = s - jnp.max(s, axis=-1, keepdims=True)
        p = jnp.exp(s)
        # (approx=True routes to the EUP when exact probabilities aren't needed)
        p = p * pl.reciprocal(jnp.sum(p, axis=-1, keepdims=True), approx=False)

        s_ref[0, head] = p.astype(s_ref.dtype)
        ctx_parts.append(jnp.dot(p.astype(compute_dtype), vh,
                                 preferred_element_type=jnp.float32))

    # heads merged along lanes in-kernel -> lane-dense (tq, d_model) store,
    # no merge-heads transpose in the wrapper.
    o_ref[0] = jnp.concatenate(ctx_parts, axis=-1).astype(o_ref.dtype)


def attention(qkv, mask_i8, *, h, d_k, compute_dtype, tq_target=256):
    """qkv: (B, S, 3*d_model) fused projections; mask_i8: (B, 1, S, S) int8.

    Returns (context (B, S, d_model) in compute_dtype,
             attention probabilities (B, h, S, S) f32)."""
    B, S, three_d = qkv.shape
    d_model = h * d_k
    assert three_d == 3 * d_model
    tq = _pick_tile(S, tq_target, 8)
    kernel = functools.partial(_attention_kernel, h=h, d_k=d_k, tq=tq,
                               scale=1.0 / math.sqrt(d_k),
                               compute_dtype=compute_dtype)
    return pl.pallas_call(
        kernel,
        grid=(B, S // tq),
        out_shape=(jax.ShapeDtypeStruct((B, S, d_model), compute_dtype),
                   jax.ShapeDtypeStruct((B, h, S, S), jnp.float32)),
        in_specs=[
            # fused q|k|v block: index_map ignores qi -> DMA'd once per batch
            pl.BlockSpec((1, S, three_d), lambda b, qi: (b, 0, 0)),
            pl.BlockSpec((1, 1, tq, S), lambda b, qi: (b, 0, qi, 0)),
        ],
        out_specs=(
            pl.BlockSpec((1, tq, d_model), lambda b, qi: (b, qi, 0)),
            pl.BlockSpec((1, h, tq, S), lambda b, qi: (b, 0, qi, 0)),
        ),
        compiler_params=pltpu.CompilerParams(
            dimension_semantics=("parallel", "arbitrary")),
    )(qkv, mask_i8)


# ----------------------------------------------------------------------------
# Parameter prep (one-time) + full forward
# ----------------------------------------------------------------------------
def prepare_params(params, compute_dtype=jnp.float32):
    """Transpose weights to (d_in, d_out), fuse q/k/v, reshape biases once."""
    cd = compute_dtype
    wq_t, wk_t, wv_t = params["w_q"].T, params["w_k"].T, params["w_v"].T
    return {
        "w_qkv": jnp.concatenate([wq_t, wk_t, wv_t], axis=1).astype(cd),
        "b_qkv": jnp.concatenate([params["b_q"], params["b_k"],
                                  params["b_v"]]).reshape(1, -1).astype(jnp.float32),
        "w_q_t": wq_t.astype(cd), "b_q": params["b_q"].reshape(1, -1).astype(jnp.float32),
        "w_k_t": wk_t.astype(cd), "b_k": params["b_k"].reshape(1, -1).astype(jnp.float32),
        "w_v_t": wv_t.astype(cd), "b_v": params["b_v"].reshape(1, -1).astype(jnp.float32),
        "w_o_t": params["w_o"].T.astype(cd),
        "b_o": params["b_o"].reshape(1, -1).astype(jnp.float32),
    }


def multi_head_attention_block(prep, q, k, v, mask, *, h,
                               compute_dtype=jnp.float32):
    B, S, d_model = q.shape
    d_k = d_model // h
    M = B * S
    cd = compute_dtype

    if mask is None:                       # no mask -> attend to everything
        mask = jnp.ones((B, 1, S, S), jnp.int8)
    mask_i8 = mask.astype(jnp.int8)        # int8: 4x less mask HBM traffic than int32

    if (q is k) and (k is v):
        # self-attention: fused qkv projection, input streamed from HBM once
        qkv = linear(q.reshape(M, d_model), prep["w_qkv"], prep["b_qkv"],
                     out_dtype=cd)
    else:
        # cross-attention fallback: separate (still tiled) projections
        qq = linear(q.reshape(M, d_model), prep["w_q_t"], prep["b_q"], out_dtype=cd)
        kk = linear(k.reshape(M, d_model), prep["w_k_t"], prep["b_k"], out_dtype=cd)
        vv = linear(v.reshape(M, d_model), prep["w_v_t"], prep["b_v"], out_dtype=cd)
        qkv = jnp.concatenate([qq, kk, vv], axis=-1)

    qkv = qkv.reshape(B, S, 3 * d_model)           # free reshape, no transpose
    ctx, attn_scores = attention(qkv, mask_i8, h=h, d_k=d_k, compute_dtype=cd)

    # TODO(synk): training-mode dropout on attention probabilities (eval path only).
    out = linear(ctx.reshape(M, d_model), prep["w_o_t"], prep["b_o"],
                 out_dtype=jnp.float32)
    return out.reshape(B, S, d_model), attn_scores


# pure-JAX reference (mirrors the PyTorch forward, eval-mode dropout)
def reference(params, q, k, v, mask, *, h):
    B, S, d_model = q.shape
    d_k = d_model // h

    def lin(x, w, b):
        return x @ w.T + b

    query = lin(q, params["w_q"], params["b_q"])
    key = lin(k, params["w_k"], params["b_k"])
    value = lin(v, params["w_v"], params["b_v"])

    def split(x):
        return x.reshape(B, S, h, d_k).transpose(0, 2, 1, 3)

    qh, kh, vh = split(query), split(key), split(value)
    scores = (qh @ kh.transpose(0, 1, 3, 2)) / math.sqrt(d_k)
    scores = jnp.where(mask == 0, -1e9, scores)
    scores = jax.nn.softmax(scores, axis=-1)
    x = (scores @ vh).transpose(0, 2, 1, 3).reshape(B, S, d_model)
    return lin(x, params["w_o"], params["b_o"]), scores


if __name__ == "__main__":
    B, S, d_model, h = 2, 8, 32, 4

    key0 = jax.random.PRNGKey(0)
    keys = jax.random.split(key0, 12)
    scale = 1.0 / math.sqrt(d_model)

    params = {
        "w_q": jax.random.normal(keys[0], (d_model, d_model), jnp.float32) * scale,
        "b_q": jax.random.normal(keys[1], (d_model,), jnp.float32) * 0.01,
        "w_k": jax.random.normal(keys[2], (d_model, d_model), jnp.float32) * scale,
        "b_k": jax.random.normal(keys[3], (d_model,), jnp.float32) * 0.01,
        "w_v": jax.random.normal(keys[4], (d_model, d_model), jnp.float32) * scale,
        "b_v": jax.random.normal(keys[5], (d_model,), jnp.float32) * 0.01,
        "w_o": jax.random.normal(keys[6], (d_model, d_model), jnp.float32) * scale,
        "b_o": jax.random.normal(keys[7], (d_model,), jnp.float32) * 0.01,
    }

    x = jax.random.normal(keys[8], (B, S, d_model), jnp.float32)
    qx = jax.random.normal(keys[9], (B, S, d_model), jnp.float32)
    kx = jax.random.normal(keys[10], (B, S, d_model), jnp.float32)
    vx = jax.random.normal(keys[11], (B, S, d_model), jnp.float32)

    # causal mask (B, 1, S, S), 0 = masked out (matches mask==0 -> -1e9)
    causal = jnp.tril(jnp.ones((S, S), jnp.int32))
    mask = jnp.broadcast_to(causal[None, None], (B, 1, S, S))

    # ---- f32 path, self-attention (fused qkv projection) ----
    prep = prepare_params(params, jnp.float32)
    out, scores = multi_head_attention_block(prep, x, x, x, mask, h=h)
    out = jax.block_until_ready(out)
    scores = jax.block_until_ready(scores)
    ref_out, ref_scores = reference(params, x, x, x, mask, h=h)
    assert out.shape == (B, S, d_model)
    assert scores.shape == (B, h, S, S)
    assert jnp.allclose(out, ref_out, atol=1e-4, rtol=1e-4)
    assert jnp.allclose(scores, ref_scores, atol=1e-5, rtol=1e-4)

    # ---- f32 path, cross-attention (separate projections) ----
    out2, scores2 = multi_head_attention_block(prep, qx, kx, vx, mask, h=h)
    out2 = jax.block_until_ready(out2)
    ref_out2, ref_scores2 = reference(params, qx, kx, vx, mask, h=h)
    assert jnp.allclose(out2, ref_out2, atol=1e-4, rtol=1e-4)
    assert jnp.allclose(scores2, ref_scores2, atol=1e-5, rtol=1e-4)

    # ---- bf16 fast path (MXU-peak dtype), loose tolerance vs f32 reference ----
    prep_bf16 = prepare_params(params, jnp.bfloat16)
    out3, scores3 = multi_head_attention_block(prep_bf16, x, x, x, mask, h=h,
                                               compute_dtype=jnp.bfloat16)
    out3 = jax.block_until_ready(out3)
    assert out3.dtype == jnp.float32
    assert jnp.allclose(out3, ref_out, atol=1e-1, rtol=1e-1)
    assert jnp.allclose(scores3, ref_scores, atol=5e-2, rtol=5e-2)

    print("KERNEL_OK")
</pallas_src>

<mosaic_0001>
module attributes {stable_mosaic.version = 11 : i64} {
  func.func @_linear_kernel(%arg0: i32, %arg1: i32, %arg2: i32, %arg3: memref<16x32xf32, #tpu.memory_space<vmem>>, %arg4: memref<32x96xf32, #tpu.memory_space<vmem>>, %arg5: memref<1x96xf32, #tpu.memory_space<vmem>>, %arg6: memref<16x96xf32, #tpu.memory_space<vmem>>, %arg7: memref<16x96xf32, #tpu.memory_space<vmem>>) attributes {dimension_semantics = [#tpu.dimension_semantics<parallel>, #tpu.dimension_semantics<parallel>, #tpu.dimension_semantics<arbitrary>], iteration_bounds = array<i64: 1, 1, 1>, scalar_prefetch = 0 : i64, scratch_operands = 1 : i64, tpu.core_type = #tpu.core_type<tc>, window_params = [{transform_indices = @transform_0, window_bounds = array<i64: 16, 32>}, {transform_indices = @transform_1, window_bounds = array<i64: 32, 96>}, {transform_indices = @transform_2, window_bounds = array<i64: 1, 96>}, {transform_indices = @transform_3, window_bounds = array<i64: 16, 96>}]} {
    %c0_i32 = arith.constant 0 : i32
    %0 = arith.cmpi eq, %arg2, %c0_i32 : i32
    %1 = arith.extui %0 : i1 to i32
    %c0_i32_0 = arith.constant 0 : i32
    %2 = arith.cmpi ne, %1, %c0_i32_0 : i32
    scf.if %2 {
      %cst_10 = arith.constant 0.000000e+00 : f32
      %12 = vector.broadcast %cst_10 : f32 to vector<16x96xf32>
      %c0_11 = arith.constant 0 : index
      %c0_12 = arith.constant 0 : index
      %13 = vector.load %arg7[%c0_11, %c0_12] : memref<16x96xf32, #tpu.memory_space<vmem>>, vector<16x96xf32>
      tpu.vector_store %arg7[%c0_11, %c0_12], %12 {strides = array<i32>} : memref<16x96xf32, #tpu.memory_space<vmem>>, vector<16x96xf32>,
    } else {
    }
    %c0 = arith.constant 0 : index
    %c0_1 = arith.constant 0 : index
    %3 = vector.load %arg7[%c0, %c0_1] : memref<16x96xf32, #tpu.memory_space<vmem>>, vector<16x96xf32>
    %c0_2 = arith.constant 0 : index
    %c0_3 = arith.constant 0 : index
    %4 = vector.load %arg3[%c0_2, %c0_3] : memref<16x32xf32, #tpu.memory_space<vmem>>, vector<16x32xf32>
    %c0_4 = arith.constant 0 : index
    %c0_5 = arith.constant 0 : index
    %5 = vector.load %arg4[%c0_4, %c0_5] : memref<32x96xf32, #tpu.memory_space<vmem>>, vector<32x96xf32>
    %cst = arith.constant dense<0.000000e+00> : vector<16x96xf32>
    %6 = tpu.matmul %4, %5, %cst {dimension_numbers = #tpu.dot_dimension_numbers<[1], [0], [0], [1], [0, 0, 1, 1], [], []>} : vector<16x32xf32>, vector<32x96xf32>, vector<16x96xf32> -> vector<16x96xf32>
    %7 = arith.addf %3, %6 : vector<16x96xf32>
    %c0_6 = arith.constant 0 : index
    %c0_7 = arith.constant 0 : index
    %8 = vector.load %arg7[%c0_6, %c0_7] : memref<16x96xf32, #tpu.memory_space<vmem>>, vector<16x96xf32>
    tpu.vector_store %arg7[%c0_6, %c0_7], %7 {strides = array<i32>} : memref<16x96xf32, #tpu.memory_space<vmem>>, vector<16x96xf32>,
    %c0_i32_8 = arith.constant 0 : i32
    %9 = arith.cmpi eq, %arg2, %c0_i32_8 : i32
    %10 = arith.extui %9 : i1 to i32
    %c0_i32_9 = arith.constant 0 : i32
    %11 = arith.cmpi ne, %10, %c0_i32_9 : i32
    scf.if %11 {
      %c0_10 = arith.constant 0 : index
      %c0_11 = arith.constant 0 : index
      %12 = vector.load %arg7[%c0_10, %c0_11] : memref<16x96xf32, #tpu.memory_space<vmem>>, vector<16x96xf32>
      %c0_12 = arith.constant 0 : index
      %c0_13 = arith.constant 0 : index
      %13 = vector.load %arg5[%c0_12, %c0_13] : memref<1x96xf32, #tpu.memory_space<vmem>>, vector<1x96xf32>
      %14 = vector.broadcast %13 : vector<1x96xf32> to vector<16x96xf32>
      %15 = arith.addf %12, %14 : vector<16x96xf32>
      %c0_14 = arith.constant 0 : index
      %c0_15 = arith.constant 0 : index
      %16 = vector.load %arg6[%c0_14, %c0_15] : memref<16x96xf32, #tpu.memory_space<vmem>>, vector<16x96xf32>
      tpu.vector_store %arg6[%c0_14, %c0_15], %15 {strides = array<i32>} : memref<16x96xf32, #tpu.memory_space<vmem>>, vector<16x96xf32>,
    } else {
    }
    return
  }
  func.func @transform_0(%arg0: i32, %arg1: i32, %arg2: i32) -> (i32, i32) {
    %c0_i32 = arith.constant 0 : i32
    return %arg0, %arg2 : i32, i32
  }
  func.func @transform_1(%arg0: i32, %arg1: i32, %arg2: i32) -> (i32, i32) {
    %c0_i32 = arith.constant 0 : i32
    return %arg2, %arg1 : i32, i32
  }
  func.func @transform_2(%arg0: i32, %arg1: i32, %arg2: i32) -> (i32, i32) {
    %c0_i32 = arith.constant 0 : i32
    %c0_i32_0 = arith.constant 0 : i32
    return %c0_i32, %arg1 : i32, i32
  }
  func.func @transform_3(%arg0: i32, %arg1: i32, %arg2: i32) -> (i32, i32) {
    %c0_i32 = arith.constant 0 : i32
    return %arg0, %arg1 : i32, i32
  }
}

</mosaic_0001>

<bundles_post_ra>
// kernel: tpu_custom_call.1
= control target key start
LH: loop header
LB: loop body
LE: loop exit
PB: predicated region body
PF: predicated region fallthrough
CT: control target
= control target key end

     0   :  { %8 = vsyncpa [#allocation4], 0  ;;  %s274_s0 = inlined_call_operand.hbm [shape: f32[16,32], index: 0, kind: input, shape index: {}]   ;;  %s275_s1 = inlined_call_operand.hbm [shape: f32[32,96], index: 1, kind: input, shape index: {}]   ;;  %s276_s2 = inlined_call_operand.vmem [shape: f32[1,96], index: 2, kind: input, shape index: {}]   ;;  %s277_s3 = inlined_call_operand.hbm [shape: f32[16,96], index: 3, kind: output, shape index: {}]  }
   0x1   :  { %9 = vsyncpa [#allocation7], 0 }
   0x2   :  { %10 = vsyncpa [#allocation5], 0  ;;  %s15_s14 = sshll.u32 %s274_s0, 4  ;;  %s221_s15 = smov [#allocation3]   ;;  %s16_s14 = int_to_ptr.hbm [resolvable:$true] %s15_s14 }
   0x3   :  { %s17_s16 = sshll.u32 %s221_s15, 4  ;;  %s28_s19 = sshll.u32 %s275_s1, 4  ;;  %s18_s16 = int_to_ptr.vmem [resolvable:$true] %s17_s16  ;;  %s29_s19 = int_to_ptr.hbm [resolvable:$true] %s28_s19 }
   0x4   :  { %s222_s20 = smov 128   ;;  %s223_s21 = smov 8  }
   0x5   :  { %23 = dma.hbm_to_vmem [thread:$0]  %s16_s14, 256, %s18_s16, [#allocation4], %s222_s20, %s222_s20, %s223_s21  }
   0x6   :  { %s224_s22 = smov [#allocation6]  }
   0x7   :  { %s30_s23 = sshll.u32 %s224_s22, 4  ;;  %s31_s23 = int_to_ptr.vmem [resolvable:$true] %s30_s23 }
   0x8   :  { %36 = dma.hbm_to_vmem [thread:$0]  %s29_s19, 512, %s31_s23, [#allocation7], %s222_s20, %s222_s20, %s223_s21  }
   0x9   :  { %215 = dma.done.wait [#allocation4], 256  }
   0xa   :  { %216 = vsyncadd [#allocation4], 4294967040 }
   0xb   :  { %217 = dma.done.wait [#allocation7], 512  }
   0xc   :  { %218 = vsyncadd [#allocation7], 4294966784  ;;  %vm51_vm0 = vcmask 785408   ;;  %v225_v0 = vmov 0.0   ;;  %v61_v1 = vld [vmem:[#allocation6 + $0x18] sm:$0xff]  ;;  %v60_v2 = vld [vmem:[#allocation6 + $0x10] sm:$0xff] }
   0xd   :  { %52 = vst.msk [vmem:[#allocation2] sm:$0xff] %vm51_vm0, %v225_v0  ;;  %81 = vmatpush.msra.mxu0 %v61_v1  ;;  %132 = vmatpush.msra.mxu1 %v61_v1  ;;  %v59_v3 = vld [vmem:[#allocation6 + $0x8] sm:$0xff]  ;;  %v58_v4 = vld [vmem:[#allocation6] sm:$0xff]  ;;  %v56_v5 = vld [vmem:[#allocation3] sm:$0xff]  ;;  %vm62_vm1 = vcmask 261120   ;;  %s226_s24 = smov [#allocation8]  }
   0xe   :  { %53 = vst.msk [vmem:[#allocation2 + $0x8] sm:$0xff] %vm51_vm0, %v225_v0  ;;  %v57_v6 = vld [vmem:[#allocation3 + $0x8] sm:$0xff]  ;;  %v142_v13 = vld [vmem:[%s276_s2] ss:$0 sm:$0xff]  ;;  %s114_s25 = sshll.u32 %s226_s24, 4  ;;  %s116_s28 = sshll.u32 %s277_s3, 4  ;;  %s115_s25 = int_to_ptr.vmem [resolvable:$true] %s114_s25  ;;  %s117_s28 = int_to_ptr.hbm [resolvable:$true] %s116_s28 }
   0xf   :  { %82 = vmatpush.msra.mxu0 %v60_v2  ;;  %133 = vmatpush.msra.mxu1 %v60_v2 }
  0x11   :  { %83 = vmatpush.msra.mxu0 %v59_v3  ;;  %134 = vmatpush.msra.mxu1 %v59_v3 }
  0x13   :  { %84 = vmatpush.msra.mxu0 %v58_v4  ;;  %135 = vmatpush.msra.mxu1 %v58_v4 }
  0x14   :  { %130 = vmatmul.msk.f32.vlgmr.msra.gmra.mxu0 %vm62_vm1, %v56_v5  ;;  %131 = vmatmul.msk.f32.vlgmr.msra.gmra.mxu1 %vm62_vm1, %v57_v6  ;;  %v54_v7 = vld [vmem:[#allocation2] sm:$0xff] }
  0x15   :  { %v55_v8 = vld [vmem:[#allocation2 + $0x8] sm:$0xff] }
  0x91   :  { %v86_v9 = vpop.f32.mrf.mxu0  ;;  %v89_v10 = vpop.f32.mrf.mxu1 }
  0x92   :  { %v92_v11 = vadd.f32 %v86_v9, %v54_v7  ;;  %v93_v12 = vadd.f32 %v89_v10, %v55_v8 }
  0x94   :  { %95 = vst.msk [vmem:[#allocation2] sm:$0xff] %vm51_vm0, %v92_v11 }
  0x95   :  { %96 = vst.msk [vmem:[#allocation2 + $0x8] sm:$0xff] %vm51_vm0, %v93_v12 }
  0x9b   :  { %v100_v14 = vld [vmem:[#allocation2] sm:$0xff] }
  0x9c   :  { %v101_v15 = vld [vmem:[#allocation2 + $0x8] sm:$0xff]  ;;  %v106_v16 = vadd.f32 %v142_v13, %v100_v14 }
  0x9d   :  { %v107_v17 = vadd.f32 %v142_v13, %v101_v15 }
  0x9e   :  { %108 = vst.msk [vmem:[#allocation8] sm:$0xff] %vm51_vm0, %v106_v16 }
  0x9f   :  { %109 = vst.msk [vmem:[#allocation8 + $0x8] sm:$0xff] %vm51_vm0, %v107_v17 }
  0xa0   :  { %122 = dma.vmem_to_hbm [thread:$0]  %s115_s25, 256, %s117_s28, [#allocation5], %s222_s20, %s222_s20, %s223_s21  }
  0xa1   :  { %219 = dma.done.wait [#allocation5], 256  }
  0xa2   :  { %220 = vsyncadd [#allocation5], 4294967040 }
  0xa3   :  { %127 = vsyncpa [#allocation4], 1 }
  0xa4   :  { %128 = vsyncpa [#allocation7], 1 }
  0xa5   :  { %129 = vsyncpa [#allocation5], 1 }

</bundles_post_ra>
